<compile_context>
chip_gen: v7x
topology: tpu7x:2x2x1
jax: 0.10.0
libtpu: 0.0.40
codegen_flags: <defaults>
</compile_context>

<pallas_src>
import functools

import jax
import jax.numpy as jnp
from jax.experimental import pallas as pl
from jax.experimental.pallas import tpu as pltpu


def _round_up(n: int, m: int) -> int:
    return ((n + m - 1) // m) * m


def _device_hints():
    """Return (vmem_budget_bytes, prefer_two_grid_steps) based on TPU generation.

    Conservative defaults if the device kind cannot be queried.
    """
    budget = 40 << 20
    two_steps = False
    try:
        kind = jax.devices()[0].device_kind.lower()
        if "v7" in kind:
            budget = 28 << 20   # 64 MiB physical VMEM per TensorCore on v7x
            two_steps = True    # 2 TCs/chip -> want >=2 parallel grid steps
        elif "v6" in kind or "v5" in kind or "lite" in kind:
            budget = 48 << 20   # 128 MiB physical VMEM on v5e/v6e
    except Exception:
        pass
    return budget, two_steps


def _mlp_fused_kernel(x_ref, *refs, num_layers, sigmoid_output):
    """Whole MLP on one batch tile. refs = (w0, b0, w1, b1, ..., o_ref)."""
    o_ref = refs[-1]
    wb_refs = refs[:-1]
    h = x_ref[...].astype(jnp.float32)
    # TODO(synk): for hidden dims >= 2048, slab the output-feature dim (256-512 wide)
    # inside this loop so bias+ReLU overlap the MXU instead of keeping a full-width h live.
    for i in range(num_layers):
        w = wb_refs[2 * i][...]                              # bf16 weights (MXU operand)
        b = wb_refs[2 * i + 1][...].astype(jnp.float32)      # (1, d_out) broadcasts over rows
        h = jnp.dot(h.astype(jnp.bfloat16), w,
                    preferred_element_type=jnp.float32) + b  # f32 accumulate + f32 bias
        if i < num_layers - 1:
            h = jnp.maximum(h, 0.0)                          # ReLU on the VPU (f32)
    if sigmoid_output:
        h = jax.nn.sigmoid(h)                                # transcendental -> EUP slot (f32)
    o_ref[...] = h.astype(o_ref.dtype)


def mlp_forward_pallas(x, padded_params, *, num_layers, sigmoid_output, output_dim):
    """Run the whole MLP in a single fused pallas_call.

    x: (B, input_dim) float32 (unpadded, user-facing).
    padded_params: list of (w_p, b_p) bf16 with lane-dense (128-multiple) feature dims.
    Returns (B, output_dim) float32.
    """
    B, d_in = x.shape
    p_in = padded_params[0][0].shape[0]
    p_out = padded_params[-1][0].shape[1]
    max_p = max(max(w.shape) for (w, _) in padded_params)

    weights_bytes = sum(
        w.size * w.dtype.itemsize + b.size * b.dtype.itemsize for (w, b) in padded_params
    )

    # ---- batch-tile sizing from the VMEM budget ----------------------------------
    budget, two_steps = _device_hints()
    pB = _round_up(B, 8)  # only pad to the sublane multiple; ragged grid handles the rest
    # Per-row bytes: double-buffered x tile + double-buffered out tile + live h (with slack).
    per_row = 4 * (2 * p_in + 2 * p_out + 2 * max_p)
    avail = max(budget - weights_bytes, per_row * 8)  # weights are single-buffered (Buffered(1))
    tile_b = int(avail // per_row)
    tile_b = max(8, min((tile_b // 8) * 8, 1024, pB))
    if two_steps and pB >= 16:
        # v7x: keep >=2 grid steps so the parallel batch axis shards across both TensorCores.
        tile_b = min(tile_b, _round_up(-(-pB // 2), 8))

    # TODO(synk): if weights_bytes alone exceeds the VMEM budget (huge hidden dims on v7x),
    # stream each layer's weights over an output-feature sub-grid instead of holding all
    # layers resident; not needed for this config.

    act_bytes = tile_b * per_row
    vmem_limit = int(min(max(int(1.5 * (weights_bytes + act_bytes)) + (2 << 20), 32 << 20),
                         64 << 20))

    # ---- lane-dense input (feature pad must be exact zero; batch pad <= 7 rows) ---
    x_p = jnp.zeros((pB, p_in), dtype=x.dtype).at[:B, :d_in].set(x)

    in_specs = [pl.BlockSpec((tile_b, p_in), lambda i: (i, 0))]
    flat_wb = []
    for (w_p, b_p) in padded_params:
        # Constant index_map -> DMA'd once; Buffered(1) removes the redundant second buffer.
        in_specs.append(pl.BlockSpec(w_p.shape, lambda i: (0, 0),
                                     pipeline_mode=pl.Buffered(1)))
        in_specs.append(pl.BlockSpec(b_p.shape, lambda i: (0, 0),
                                     pipeline_mode=pl.Buffered(1)))
        flat_wb.extend((w_p, b_p))

    kernel = functools.partial(
        _mlp_fused_kernel, num_layers=num_layers, sigmoid_output=sigmoid_output
    )

    flops = 2 * B * sum(w.shape[0] * w.shape[1] for (w, _) in padded_params)
    bytes_accessed = (x_p.size * x_p.dtype.itemsize
                      + pB * p_out * jnp.dtype(x.dtype).itemsize
                      + weights_bytes)
    transcendentals = B * p_out if sigmoid_output else 0

    out_p = pl.pallas_call(
        kernel,
        out_shape=jax.ShapeDtypeStruct((pB, p_out), x.dtype),
        grid=(pl.cdiv(pB, tile_b),),
        in_specs=in_specs,
        out_specs=pl.BlockSpec((tile_b, p_out), lambda i: (i, 0)),
        compiler_params=pltpu.CompilerParams(
            # Batch axis is independent -> shardable across the 2 TCs on v7x.
            dimension_semantics=("parallel",),
            vmem_limit_bytes=vmem_limit,
        ),
        cost_estimate=pl.CostEstimate(
            flops=flops,
            transcendentals=transcendentals,
            bytes_accessed=bytes_accessed,
        ),
    )(x_p, *flat_wb)

    return out_p[:B, :output_dim]


class MLP:
    """JAX/Pallas port of the PyTorch MLP module.

    num_layers Linear layers; ReLU after every layer except the last;
    optional sigmoid on the output; dropout=0.0 -> identity.
    """

    def __init__(
        self,
        *,
        input_dim: int,
        hidden_dim: int | None = None,
        output_dim: int | None = None,
        num_layers: int,
        sigmoid_output: bool = False,
        drop_out: float = 0.0,
        key: jax.Array,
    ):
        hidden_dim = hidden_dim or input_dim
        output_dim = output_dim or input_dim
        self.num_layers = num_layers
        self.output_dim = output_dim
        self.sigmoid_output = sigmoid_output
        # TODO(synk): dropout > 0.0 (train-mode) not implemented; config uses 0.0 (identity).
        assert drop_out == 0.0

        hidden_layers = [hidden_dim] * (num_layers - 1)
        dims = list(zip([input_dim] + hidden_layers, hidden_layers + [output_dim]))

        self.params = []         # true (unpadded, f32) weights, used for the reference check
        self.padded_params = []  # lane-dense zero-padded bf16 copies fed to the kernel
        for (n_in, n_out) in dims:
            key, wk, bk = jax.random.split(key, 3)
            # Deterministic init mimicking nn.Linear's uniform(-1/sqrt(fan_in), 1/sqrt(fan_in)).
            bound = 1.0 / (n_in ** 0.5)
            w = jax.random.uniform(
                wk, (n_in, n_out), dtype=jnp.float32, minval=-bound, maxval=bound
            )
            b = jax.random.uniform(
                bk, (1, n_out), dtype=jnp.float32, minval=-bound, maxval=bound
            )
            self.params.append((w, b))

            p_in, p_outd = _round_up(n_in, 128), _round_up(n_out, 128)
            w_p = (jnp.zeros((p_in, p_outd), jnp.float32).at[:n_in, :n_out].set(w)
                   ).astype(jnp.bfloat16)
            b_p = (jnp.zeros((1, p_outd), jnp.float32).at[:, :n_out].set(b)
                   ).astype(jnp.bfloat16)
            self.padded_params.append((w_p, b_p))

    def __call__(self, x):
        return mlp_forward_pallas(
            x,
            self.padded_params,
            num_layers=self.num_layers,
            sigmoid_output=self.sigmoid_output,
            output_dim=self.output_dim,
        )


if __name__ == "__main__":
    key = jax.random.PRNGKey(0)
    key, xk, pk = jax.random.split(key, 3)

    batch, input_dim, hidden_dim, output_dim, num_layers = 8, 32, 64, 16, 3
    x = jax.random.normal(xk, (batch, input_dim), dtype=jnp.float32)

    mlp = MLP(
        input_dim=input_dim,
        hidden_dim=hidden_dim,
        output_dim=output_dim,
        num_layers=num_layers,
        sigmoid_output=True,
        drop_out=0.0,
        key=pk,
    )

    out = jax.block_until_ready(mlp(x))

    # Pure-JAX f32 reference of the same forward pass (unpadded params).
    ref = x
    for i, (w, b) in enumerate(mlp.params):
        ref = ref @ w + b
        if i < num_layers - 1:
            ref = jnp.maximum(ref, 0.0)
    if mlp.sigmoid_output:
        ref = jax.nn.sigmoid(ref)

    assert out.shape == (batch, output_dim)
    # bf16 matmul operands with f32 accumulation -> loosened tolerance vs. the f32 reference.
    assert jnp.allclose(out, ref, atol=3e-2, rtol=3e-2), float(jnp.max(jnp.abs(out - ref)))

    print("KERNEL_OK")
</pallas_src>

<mosaic_0001>
module attributes {stable_mosaic.version = 11 : i64} {
  func.func @_mlp_fused_kernel(%arg0: i32, %arg1: memref<8x128xf32, #tpu.memory_space<vmem>>, %arg2: memref<128x128xbf16, #tpu.memory_space<vmem>>, %arg3: memref<1x128xbf16, #tpu.memory_space<vmem>>, %arg4: memref<128x128xbf16, #tpu.memory_space<vmem>>, %arg5: memref<1x128xbf16, #tpu.memory_space<vmem>>, %arg6: memref<128x128xbf16, #tpu.memory_space<vmem>>, %arg7: memref<1x128xbf16, #tpu.memory_space<vmem>>, %arg8: memref<8x128xf32, #tpu.memory_space<vmem>>) attributes {dimension_semantics = [#tpu.dimension_semantics<parallel>], iteration_bounds = array<i64: 1>, scalar_prefetch = 0 : i64, scratch_operands = 0 : i64, tpu.core_type = #tpu.core_type<tc>, window_params = [{transform_indices = @transform_0, window_bounds = array<i64: 8, 128>}, {pipeline_mode = #tpu.pipeline_mode<synchronous>, transform_indices = @transform_1, window_bounds = array<i64: 128, 128>}, {pipeline_mode = #tpu.pipeline_mode<synchronous>, transform_indices = @transform_2, window_bounds = array<i64: 1, 128>}, {pipeline_mode = #tpu.pipeline_mode<synchronous>, transform_indices = @transform_3, window_bounds = array<i64: 128, 128>}, {pipeline_mode = #tpu.pipeline_mode<synchronous>, transform_indices = @transform_4, window_bounds = array<i64: 1, 128>}, {pipeline_mode = #tpu.pipeline_mode<synchronous>, transform_indices = @transform_5, window_bounds = array<i64: 128, 128>}, {pipeline_mode = #tpu.pipeline_mode<synchronous>, transform_indices = @transform_6, window_bounds = array<i64: 1, 128>}, {transform_indices = @transform_7, window_bounds = array<i64: 8, 128>}]} {
    %c0 = arith.constant 0 : index
    %c0_0 = arith.constant 0 : index
    %0 = vector.load %arg1[%c0, %c0_0] : memref<8x128xf32, #tpu.memory_space<vmem>>, vector<8x128xf32>
    %c0_1 = arith.constant 0 : index
    %c0_2 = arith.constant 0 : index
    %1 = vector.load %arg2[%c0_1, %c0_2] : memref<128x128xbf16, #tpu.memory_space<vmem>>, vector<128x128xbf16>
    %c0_3 = arith.constant 0 : index
    %c0_4 = arith.constant 0 : index
    %2 = vector.load %arg3[%c0_3, %c0_4] : memref<1x128xbf16, #tpu.memory_space<vmem>>, vector<1x128xbf16>
    %3 = arith.extf %2 : vector<1x128xbf16> to vector<1x128xf32>
    %4 = arith.truncf %0 : vector<8x128xf32> to vector<8x128xbf16>
    %cst = arith.constant dense<0.000000e+00> : vector<8x128xf32>
    %5 = tpu.matmul %4, %1, %cst {dimension_numbers = #tpu.dot_dimension_numbers<[1], [0], [0], [1], [0, 0, 1, 1], [], []>} : vector<8x128xbf16>, vector<128x128xbf16>, vector<8x128xf32> -> vector<8x128xf32>
    %6 = vector.broadcast %3 : vector<1x128xf32> to vector<8x128xf32>
    %7 = arith.addf %5, %6 : vector<8x128xf32>
    %cst_5 = arith.constant 0.000000e+00 : f32
    %8 = vector.broadcast %cst_5 : f32 to vector<8x128xf32>
    %9 = arith.maximumf %7, %8 : vector<8x128xf32>
    %c0_6 = arith.constant 0 : index
    %c0_7 = arith.constant 0 : index
    %10 = vector.load %arg4[%c0_6, %c0_7] : memref<128x128xbf16, #tpu.memory_space<vmem>>, vector<128x128xbf16>
    %c0_8 = arith.constant 0 : index
    %c0_9 = arith.constant 0 : index
    %11 = vector.load %arg5[%c0_8, %c0_9] : memref<1x128xbf16, #tpu.memory_space<vmem>>, vector<1x128xbf16>
    %12 = arith.extf %11 : vector<1x128xbf16> to vector<1x128xf32>
    %13 = arith.truncf %9 : vector<8x128xf32> to vector<8x128xbf16>
    %cst_10 = arith.constant dense<0.000000e+00> : vector<8x128xf32>
    %14 = tpu.matmul %13, %10, %cst_10 {dimension_numbers = #tpu.dot_dimension_numbers<[1], [0], [0], [1], [0, 0, 1, 1], [], []>} : vector<8x128xbf16>, vector<128x128xbf16>, vector<8x128xf32> -> vector<8x128xf32>
    %15 = vector.broadcast %12 : vector<1x128xf32> to vector<8x128xf32>
    %16 = arith.addf %14, %15 : vector<8x128xf32>
    %cst_11 = arith.constant 0.000000e+00 : f32
    %17 = vector.broadcast %cst_11 : f32 to vector<8x128xf32>
    %18 = arith.maximumf %16, %17 : vector<8x128xf32>
    %c0_12 = arith.constant 0 : index
    %c0_13 = arith.constant 0 : index
    %19 = vector.load %arg6[%c0_12, %c0_13] : memref<128x128xbf16, #tpu.memory_space<vmem>>, vector<128x128xbf16>
    %c0_14 = arith.constant 0 : index
    %c0_15 = arith.constant 0 : index
    %20 = vector.load %arg7[%c0_14, %c0_15] : memref<1x128xbf16, #tpu.memory_space<vmem>>, vector<1x128xbf16>
    %21 = arith.extf %20 : vector<1x128xbf16> to vector<1x128xf32>
    %22 = arith.truncf %18 : vector<8x128xf32> to vector<8x128xbf16>
    %cst_16 = arith.constant dense<0.000000e+00> : vector<8x128xf32>
    %23 = tpu.matmul %22, %19, %cst_16 {dimension_numbers = #tpu.dot_dimension_numbers<[1], [0], [0], [1], [0, 0, 1, 1], [], []>} : vector<8x128xbf16>, vector<128x128xbf16>, vector<8x128xf32> -> vector<8x128xf32>
    %24 = vector.broadcast %21 : vector<1x128xf32> to vector<8x128xf32>
    %25 = arith.addf %23, %24 : vector<8x128xf32>
    %26 = arith.negf %25 : vector<8x128xf32>
    %27 = math.exp %26 : vector<8x128xf32>
    %cst_17 = arith.constant 1.000000e+00 : f32
    %28 = vector.broadcast %cst_17 : f32 to vector<8x128xf32>
    %29 = arith.addf %28, %27 : vector<8x128xf32>
    %30 = arith.divf %28, %29 : vector<8x128xf32>
    %c0_18 = arith.constant 0 : index
    %c0_19 = arith.constant 0 : index
    %31 = vector.load %arg8[%c0_18, %c0_19] : memref<8x128xf32, #tpu.memory_space<vmem>>, vector<8x128xf32>
    tpu.vector_store %arg8[%c0_18, %c0_19], %30 {strides = array<i32>} : memref<8x128xf32, #tpu.memory_space<vmem>>, vector<8x128xf32>,
    return
  }
  func.func @transform_0(%arg0: i32) -> (i32, i32) {
    %c0_i32 = arith.constant 0 : i32
    %c0_i32_0 = arith.constant 0 : i32
    return %arg0, %c0_i32 : i32, i32
  }
  func.func @transform_1(%arg0: i32) -> (i32, i32) {
    %c0_i32 = arith.constant 0 : i32
    %c0_i32_0 = arith.constant 0 : i32
    %c0_i32_1 = arith.constant 0 : i32
    return %c0_i32, %c0_i32_0 : i32, i32
  }
  func.func @transform_2(%arg0: i32) -> (i32, i32) {
    %c0_i32 = arith.constant 0 : i32
    %c0_i32_0 = arith.constant 0 : i32
    %c0_i32_1 = arith.constant 0 : i32
    return %c0_i32, %c0_i32_0 : i32, i32
  }
  func.func @transform_3(%arg0: i32) -> (i32, i32) {
    %c0_i32 = arith.constant 0 : i32
    %c0_i32_0 = arith.constant 0 : i32
    %c0_i32_1 = arith.constant 0 : i32
    return %c0_i32, %c0_i32_0 : i32, i32
  }
  func.func @transform_4(%arg0: i32) -> (i32, i32) {
    %c0_i32 = arith.constant 0 : i32
    %c0_i32_0 = arith.constant 0 : i32
    %c0_i32_1 = arith.constant 0 : i32
    return %c0_i32, %c0_i32_0 : i32, i32
  }
  func.func @transform_5(%arg0: i32) -> (i32, i32) {
    %c0_i32 = arith.constant 0 : i32
    %c0_i32_0 = arith.constant 0 : i32
    %c0_i32_1 = arith.constant 0 : i32
    return %c0_i32, %c0_i32_0 : i32, i32
  }
  func.func @transform_6(%arg0: i32) -> (i32, i32) {
    %c0_i32 = arith.constant 0 : i32
    %c0_i32_0 = arith.constant 0 : i32
    %c0_i32_1 = arith.constant 0 : i32
    return %c0_i32, %c0_i32_0 : i32, i32
  }
  func.func @transform_7(%arg0: i32) -> (i32, i32) {
    %c0_i32 = arith.constant 0 : i32
    %c0_i32_0 = arith.constant 0 : i32
    return %arg0, %c0_i32 : i32, i32
  }
}

</mosaic_0001>

<bundles_post_ra>
// kernel: tpu_custom_call.1
= control target key start
LH: loop header
LB: loop body
LE: loop exit
PB: predicated region body
PF: predicated region fallthrough
CT: control target
= control target key end

     0   :  { %12 = vsyncpa [#allocation3], 0  ;;  %s865_s0 = inlined_call_operand.hbm [shape: f32[8,128], index: 0, kind: input, shape index: {}]   ;;  %s866_s1 = inlined_call_operand.hbm [shape: bf16[128,128], index: 1, kind: input, shape index: {}]   ;;  %s867_s2 = inlined_call_operand.vmem [shape: bf16[1,128], index: 2, kind: input, shape index: {}]   ;;  %s868_s3 = inlined_call_operand.hbm [shape: bf16[128,128], index: 3, kind: input, shape index: {}]   ;;  %s869_s4 = inlined_call_operand.vmem [shape: bf16[1,128], index: 4, kind: input, shape index: {}]   ;;  %s870_s5 = inlined_call_operand.hbm [shape: bf16[128,128], index: 5, kind: input, shape index: {}]   ;;  %s871_s6 = inlined_call_operand.vmem [shape: bf16[1,128], index: 6, kind: input, shape index: {}]   ;;  %s872_s7 = inlined_call_operand.hbm [shape: f32[8,128], index: 7, kind: output, shape index: {}]  }
   0x1   :  { %13 = vsyncpa [#allocation6], 0 }
   0x2   :  { %14 = vsyncpa [#allocation9], 0 }
   0x3   :  { %15 = vsyncpa [#allocation4], 0  ;;  %s708_s24 = smov [#allocation5]   ;;  %s590_s28 = scalar_lea.hbm %s866_s1, 1024 }
   0x4   :  { %s31_s25 = sshll.u32 %s708_s24, 4  ;;  %p591_p0 = scmp.ne.s32.totalorder %s866_s1, %s590_s28  ;;  %s32_s25 = int_to_ptr.vmem [resolvable:$true] %s31_s25 }
   0x5   :  { %p594_p1 = scmp.lt.u32.totalorder %s590_s28, %s866_s1 }
   0x7   :  { %p596_p2 = pnand %p594_p1, %p591_p0 }
   0x9   :  { %599 = shalt.err (!%p596_p2)
}
   0xa   :  { %s600_s10 = scalar_lea.vmem %s32_s25, 1024  ;;  %p605_p4 = scmp.lt.s32.totalorder %s32_s25, %s32_s25 }
   0xb   :  { %p601_p3 = scmp.ne.s32.totalorder %s32_s25, %s600_s10  ;;  %p606_p5 = scmp.lt.s32.totalorder %s600_s10, %s600_s10 }
   0xd   :  { %p607_p6 = por %p606_p5, %p605_p4 }
   0xf   :  { %p608_p7 = pnand %p607_p6, %p601_p3 }
  0x11   :  { %611 = shalt.err (!%p608_p7)
}
  0x12   :  { %s709_s11 = smov 64   ;;  %s710_s12 = smov 4  }
  0x13   :  { %37 = dma.hbm_to_vmem [thread:$0]  %s866_s1, 1024, %s32_s25, [#allocation6], %s709_s11, %s709_s11, %s710_s12  }
  0x14   :  { %s711_s15 = smov [#allocation2]   ;;  %s712_s17 = smov [#allocation7]  }
  0x15   :  { %s22_s16 = sshll.u32 %s711_s15, 4  ;;  %s45_s18 = sshll.u32 %s712_s17, 4  ;;  %s23_s16 = int_to_ptr.vmem [resolvable:$true] %s22_s16  ;;  %s46_s18 = int_to_ptr.vmem [resolvable:$true] %s45_s18 }
  0x16   :  { %s612_s21 = scalar_lea.hbm %s865_s0, 128 }
  0x17   :  { %p613_p8 = scmp.ne.s32.totalorder %s865_s0, %s612_s21  ;;  %p616_p9 = scmp.lt.u32.totalorder %s612_s21, %s865_s0 }
  0x19   :  { %p618_p10 = pnand %p616_p9, %p613_p8 }
  0x1b   :  { %621 = shalt.err (!%p618_p10)
}
  0x1c   :  { %s622_s1 = scalar_lea.vmem %s23_s16, 128  ;;  %p627_p12 = scmp.lt.s32.totalorder %s23_s16, %s23_s16 }
  0x1d   :  { %p623_p11 = scmp.ne.s32.totalorder %s23_s16, %s622_s1  ;;  %p628_p13 = scmp.lt.s32.totalorder %s622_s1, %s622_s1 }
  0x1f   :  { %p629_p0 = por %p628_p13, %p627_p12 }
  0x21   :  { %p630_p1 = pnand %p629_p0, %p623_p11 }
  0x23   :  { %633 = shalt.err (!%p630_p1)
}
  0x24   :  { %25 = dma.hbm_to_vmem [thread:$0]  %s865_s0, 128, %s23_s16, [#allocation3]  }
  0x25   :  { %s634_s30 = scalar_lea.hbm %s868_s3, 1024 }
  0x26   :  { %p635_p2 = scmp.ne.s32.totalorder %s868_s3, %s634_s30  ;;  %p638_p3 = scmp.lt.u32.totalorder %s634_s30, %s868_s3 }
  0x28   :  { %p640_p4 = pnand %p638_p3, %p635_p2 }
  0x2a   :  { %643 = shalt.err (!%p640_p4)
}
  0x2b   :  { %s644_s14 = scalar_lea.vmem %s46_s18, 1024  ;;  %p649_p6 = scmp.lt.s32.totalorder %s46_s18, %s46_s18 }
  0x2c   :  { %p645_p5 = scmp.ne.s32.totalorder %s46_s18, %s644_s14  ;;  %p650_p7 = scmp.lt.s32.totalorder %s644_s14, %s644_s14 }
  0x2e   :  { %p651_p8 = por %p650_p7, %p649_p6 }
  0x30   :  { %p652_p9 = pnand %p651_p8, %p645_p5 }
  0x32   :  { %655 = shalt.err (!%p652_p9)
}
  0x33   :  { %51 = dma.hbm_to_vmem [thread:$0]  %s868_s3, 1024, %s46_s18, [#allocation6], %s709_s11, %s709_s11, %s710_s12  }
  0x34   :  { %s713_s16 = smov [#allocation8]   ;;  %s656_s21 = scalar_lea.hbm %s870_s5, 1024 }
  0x35   :  { %s59_s17 = sshll.u32 %s713_s16, 4  ;;  %p657_p10 = scmp.ne.s32.totalorder %s870_s5, %s656_s21  ;;  %s60_s17 = int_to_ptr.vmem [resolvable:$true] %s59_s17 }
  0x36   :  { %p660_p11 = scmp.lt.u32.totalorder %s656_s21, %s870_s5 }
  0x38   :  { %p662_p12 = pnand %p660_p11, %p657_p10 }
  0x3a   :  { %665 = shalt.err (!%p662_p12)
}
  0x3b   :  { %s666_s1 = scalar_lea.vmem %s60_s17, 1024  ;;  %p671_p0 = scmp.lt.s32.totalorder %s60_s17, %s60_s17 }
  0x3c   :  { %p667_p13 = scmp.ne.s32.totalorder %s60_s17, %s666_s1  ;;  %p672_p1 = scmp.lt.s32.totalorder %s666_s1, %s666_s1 }
  0x3e   :  { %p673_p2 = por %p672_p1, %p671_p0 }
  0x40   :  { %p674_p3 = pnand %p673_p2, %p667_p13 }
  0x42   :  { %677 = shalt.err (!%p674_p3)
}
  0x43   :  { %65 = dma.hbm_to_vmem [thread:$0]  %s870_s5, 1024, %s60_s17, [#allocation9], %s709_s11, %s709_s11, %s710_s12  }
  0x44   :  { %700 = dma.done.wait [#allocation3], 128  }
  0x45   :  { %701 = vsyncadd [#allocation3], 4294967168 }
  0x46   :  { %702 = dma.done.wait [#allocation6], 2048  }
  0x47   :  { %703 = vsyncadd [#allocation6], 4294965248 }
  0x48   :  { %704 = dma.done.wait [#allocation9], 1024  }
  0x49   :  { %705 = vsyncadd [#allocation9], 4294966272  ;;  %v714_v0 = vmov 0.0   ;;  %vm715_vm0 = vmmov 0   ;;  %v562_v1 = vld [vmem:[#allocation5] sm:$0xff]   ;;  %v563_v2 = vld [vmem:[#allocation5 + $0x8] sm:$0xff]   ;;  %v101_v25 = vlaneseq }
  0x4a   :  { %493 = vmatprep.subr.bf16.mxu0 %v714_v0  ;;  %509 = vmatprep.mubr.msk.bf16.mxu0 %vm715_vm0, %v714_v0  ;;  %v564_v3 = vld [vmem:[#allocation5 + $0x10] sm:$0xff]   ;;  %v570_v4 = vld [vmem:[#allocation7] sm:$0xff]   ;;  %v565_v5 = vld [vmem:[#allocation5 + $0x18] sm:$0xff]  }
  0x4b   :  { %513 = vmatprep.subr.bf16.mxu1 %v714_v0  ;;  %529 = vmatprep.mubr.msk.bf16.mxu1 %vm715_vm0, %v714_v0  ;;  %v571_v6 = vld [vmem:[#allocation7 + $0x8] sm:$0xff]   ;;  %v566_v7 = vld [vmem:[#allocation5 + $0x20] sm:$0xff]   ;;  %v572_v8 = vld [vmem:[#allocation7 + $0x10] sm:$0xff]   ;;  %v102_v26 = vshrl.u32 %v101_v25, 7 }
  0x4c   :  { %494 = vmatpush3.bf16.msra.mxu0 %v562_v1  ;;  %514 = vmatpush3.bf16.msra.mxu1 %v570_v4  ;;  %v567_v9 = vld [vmem:[#allocation5 + $0x28] sm:$0xff]   ;;  %v573_v10 = vld [vmem:[#allocation7 + $0x18] sm:$0xff]   ;;  %v568_v11 = vld [vmem:[#allocation5 + $0x30] sm:$0xff]  }
  0x4d   :  { %495 = vmatprep.subr.bf16.mxu0 %v714_v0  ;;  %515 = vmatprep.subr.bf16.mxu1 %v714_v0  ;;  %v574_v12 = vld [vmem:[#allocation7 + $0x20] sm:$0xff]   ;;  %v569_v13 = vld [vmem:[#allocation5 + $0x38] sm:$0xff]   ;;  %v575_v15 = vld [vmem:[#allocation7 + $0x28] sm:$0xff]   ;;  %v103_v29 = vsub.s32 0, %v102_v26 }
  0x4e   :  { %v81_v14 = vld [vmem:[#allocation2] sm:$0xff]  ;;  %v576_v17 = vld [vmem:[#allocation7 + $0x30] sm:$0xff]   ;;  %v578_v19 = vld [vmem:[#allocation8] sm:$0xff]  }
  0x4f   :  { %v100_v16 = vpack.c.bf16 %v81_v14, %v81_v14  ;;  %v577_v18 = vld [vmem:[#allocation7 + $0x38] sm:$0xff]   ;;  %v579_v20 = vld [vmem:[#allocation8 + $0x8] sm:$0xff]   ;;  %v580_v21 = vld [vmem:[#allocation8 + $0x10] sm:$0xff]  }
  0x50   :  { %496 = vmatpush3.bf16.msra.mxu0 %v563_v2  ;;  %516 = vmatpush3.bf16.msra.mxu1 %v571_v6  ;;  %v581_v22 = vld [vmem:[#allocation8 + $0x18] sm:$0xff]   ;;  %v582_v23 = vld [vmem:[#allocation8 + $0x20] sm:$0xff]   ;;  %v583_v24 = vld [vmem:[#allocation8 + $0x28] sm:$0xff]  }
  0x51   :  { %497 = vmatprep.subr.bf16.mxu0 %v714_v0  ;;  %517 = vmatprep.subr.bf16.mxu1 %v714_v0  ;;  %v98_v27 = vld [vmem:[%s867_s2] sm:$0x1]  ;;  %v584_v38 = vld [vmem:[#allocation8 + $0x30] sm:$0xff]  }
  0x52   :  { %v99_v28 = vunpack.c.l.bf16 %v98_v27  ;;  %v585_v39 = vld [vmem:[#allocation8 + $0x38] sm:$0xff]  }
  0x53   :  { %v210_v40 = vld [vmem:[%s869_s4] sm:$0x1]  ;;  %s716_s4 = smov [#allocation10]  }
  0x54   :  { %498 = vmatpush3.bf16.msra.mxu0 %v564_v3  ;;  %518 = vmatpush3.bf16.msra.mxu1 %v572_v8  ;;  %v104_v30 = vrot.slane %v99_v28, %v103_v29  ;;  %v211_v41 = vunpack.c.l.bf16 %v210_v40  ;;  %v322_v50 = vld [vmem:[%s871_s6] sm:$0x1]  ;;  %s430_s28 = sshll.u32 %s716_s4, 4  ;;  %s431_s28 = int_to_ptr.vmem [resolvable:$true] %s430_s28 }
  0x55   :  { %499 = vmatprep.subr.bf16.mxu0 %v714_v0  ;;  %519 = vmatprep.subr.bf16.mxu1 %v714_v0  ;;  %v323_v51 = vunpack.c.l.bf16 %v322_v50  ;;  %s678_s29 = scalar_lea.vmem %s431_s28, 128  ;;  %p683_p5 = scmp.lt.s32.totalorder %s431_s28, %s431_s28 }
  0x56   :  { %v216_v42 = vrot.slane %v211_v41, %v103_v29  ;;  %p679_p4 = scmp.ne.s32.totalorder %s431_s28, %s678_s29  ;;  %p684_p6 = scmp.lt.s32.totalorder %s678_s29, %s678_s29 }
  0x57   :  { %v328_v52 = vrot.slane %v323_v51, %v103_v29 }
  0x58   :  { %500 = vmatpush3.bf16.msra.mxu0 %v565_v5  ;;  %520 = vmatpush3.bf16.msra.mxu1 %v573_v10  ;;  %p685_p7 = por %p684_p6, %p683_p5 }
  0x59   :  { %501 = vmatprep.subr.bf16.mxu0 %v714_v0  ;;  %521 = vmatprep.subr.bf16.mxu1 %v714_v0 }
  0x5a   :  { %p686_p8 = pnand %p685_p7, %p679_p4 }
  0x5c   :  { %502 = vmatpush3.bf16.msra.mxu0 %v566_v7  ;;  %522 = vmatpush3.bf16.msra.mxu1 %v574_v12 }
  0x5d   :  { %503 = vmatprep.subr.bf16.mxu0 %v714_v0  ;;  %523 = vmatprep.subr.bf16.mxu1 %v714_v0 }
  0x60   :  { %504 = vmatpush3.bf16.msra.mxu0 %v567_v9  ;;  %524 = vmatpush3.bf16.msra.mxu1 %v575_v15 }
  0x61   :  { %505 = vmatprep.subr.bf16.mxu0 %v714_v0  ;;  %525 = vmatprep.subr.bf16.mxu1 %v714_v0 }
  0x64   :  { %506 = vmatpush3.bf16.msra.mxu0 %v568_v11  ;;  %526 = vmatpush3.bf16.msra.mxu1 %v576_v17 }
  0x65   :  { %507 = vmatprep.subr.bf16.mxu0 %v714_v0  ;;  %527 = vmatprep.subr.bf16.mxu1 %v714_v0 }
  0x68   :  { %508 = vmatpush3.bf16.msra.mxu0 %v569_v13  ;;  %528 = vmatpush3.bf16.msra.mxu1 %v577_v18 }
  0x69   :  { %533 = vmatprep.subr.bf16.mxu0 %v714_v0 }
  0x6b   :  { %510 = vmatmul.mubr.bf16.vlgmr.msra.gmra.mrb[0].mxu0 %v100_v16 }
  0x6c   :  { %549 = vmatprep.mubr.msk.bf16.mxu0 %vm715_vm0, %v714_v0  ;;  %534 = vmatpush3.bf16.msra.mxu0 %v578_v19 }
  0x6d   :  { %535 = vmatprep.subr.bf16.mxu0 %v714_v0 }
  0x70   :  { %536 = vmatpush3.bf16.msra.mxu0 %v579_v20 }
  0x71   :  { %537 = vmatprep.subr.bf16.mxu0 %v714_v0 }
  0x74   :  { %538 = vmatpush3.bf16.msra.mxu0 %v580_v21 }
  0x75   :  { %539 = vmatprep.subr.bf16.mxu0 %v714_v0 }
  0x78   :  { %540 = vmatpush3.bf16.msra.mxu0 %v581_v22 }
  0x79   :  { %541 = vmatprep.subr.bf16.mxu0 %v714_v0 }
  0x7c   :  { %542 = vmatpush3.bf16.msra.mxu0 %v582_v23 }
  0x7d   :  { %543 = vmatprep.subr.bf16.mxu0 %v714_v0 }
  0x80   :  { %544 = vmatpush3.bf16.msra.mxu0 %v583_v24 }
  0x81   :  { %545 = vmatprep.subr.bf16.mxu0 %v714_v0 }
  0x84   :  { %546 = vmatpush3.bf16.msra.mxu0 %v584_v38 }
  0x85   :  { %547 = vmatprep.subr.bf16.mxu0 %v714_v0 }
  0x88   :  { %548 = vmatpush3.bf16.msra.mxu0 %v585_v39 }
 0x13e   :  { %v187_v31 = vpop.f32.mrb[0].mxu0 }
 0x13f   :  { %v188_v32 = vadd.f32 %v187_v31, %v104_v30  ;;  %v511_v33 = vpop.f32.mrb[1].mxu0 }
 0x140   :  { %v190_v34 = vpop.f32.mrb[2].mxu0 }
 0x141   :  { %v193_v35 = vmax.f32 %v188_v32, 0.0  ;;  %v512_v36 = vpop.f32.mrb[3].mxu0 }
 0x143   :  { %v212_v37 = vpack.c.bf16 %v193_v35, %v193_v35 }
 0x145   :  { %530 = vmatmul.mubr.bf16.vlgmr.msra.gmra.mrb[0].mxu1 %v212_v37 }
 0x218   :  { %v299_v43 = vpop.f32.mrb[0].mxu1 }
 0x219   :  { %v300_v44 = vadd.f32 %v299_v43, %v216_v42  ;;  %v531_v45 = vpop.f32.mrb[1].mxu1 }
 0x21a   :  { %v302_v46 = vpop.f32.mrb[2].mxu1 }
 0x21b   :  { %v305_v47 = vmax.f32 %v300_v44, 0.0  ;;  %v532_v48 = vpop.f32.mrb[3].mxu1 }
 0x21d   :  { %v324_v49 = vpack.c.bf16 %v305_v47, %v305_v47 }
 0x21f   :  { %550 = vmatmul.mubr.bf16.vlgmr.msra.gmra.mrb[4].mxu0 %v324_v49 }
 0x2f2   :  { %v411_v53 = vpop.f32.mrb[4].mxu0 }
 0x2f3   :  { %v412_v54 = vadd.f32 %v411_v53, %v328_v52  ;;  %v551_v55 = vpop.f32.mrb[5].mxu0 }
 0x2f4   :  { %v414_v56 = vpop.f32.mrb[6].mxu0 }
 0x2f5   :  { %v465_v57 = vmul.f32 -1.442695, %v412_v54  ;;  %v552_v58 = vpop.f32.mrb[7].mxu0 }
 0x2f7   :  { %586 = vpow2.f32 %v465_v57 }
 0x301   :  { %v587_v59 = vpop.eup %586 }
 0x302   :  { %v420_v60 = vadd.f32 1.0, %v587_v59 }
 0x304   :  { %588 = vrcp.f32 %v420_v60 }
 0x30e   :  { %v589_v61 = vpop.eup %588 }
 0x30f   :  { %423 = vst [vmem:[#allocation10] sm:$0xff] %v589_v61 }
 0x310   :  { %689 = shalt.err (!%p686_p8)
}
 0x311   :  { %s690_s8 = scalar_lea.hbm %s872_s7, 128 }
 0x312   :  { %p691_p9 = scmp.ne.s32.totalorder %s872_s7, %s690_s8  ;;  %p694_p10 = scmp.lt.u32.totalorder %s690_s8, %s872_s7 }
 0x314   :  { %p696_p11 = pnand %p694_p10, %p691_p9 }
 0x316   :  { %699 = shalt.err (!%p696_p11)
}
 0x317   :  { %433 = dma.vmem_to_hbm [thread:$0]  %s431_s28, 128, %s872_s7, [#allocation4]  }
 0x318   :  { %706 = dma.done.wait [#allocation4], 128  }
 0x319   :  { %707 = vsyncadd [#allocation4], 4294967168 }
 0x31a   :  { %437 = vsyncpa [#allocation3], 1 }
 0x31b   :  { %438 = vsyncpa [#allocation6], 1 }
 0x31c   :  { %439 = vsyncpa [#allocation9], 1 }
 0x31d   :  { %440 = vsyncpa [#allocation4], 1 }

</bundles_post_ra>
